<compile_context>
chip_gen: v7x
topology: tpu7x:2x2x1
jax: 0.10.0
libtpu: 0.0.40
codegen_flags: <defaults>
</compile_context>

<pallas_src>
import jax
import jax.numpy as jnp
from jax.experimental import pallas as pl
from jax.experimental.pallas import tpu as pltpu


def _round_up(x, m):
    return (x + m - 1) // m * m


def _pick_cout_tile(c_out_p, target=128):
    """Largest multiple of 16 that divides c_out_p and is <= target."""
    if c_out_p <= target:
        return c_out_p
    for t in range(target, 0, -16):
        if c_out_p % t == 0:
            return t
    return 16


# Tap subsets per output parity: (k, d) pairs, where the source content
# row/col for output-plane position i is (i + d - 1).  Same table for rows
# (kh, dh) and columns (kw, dw).
_TERMS = (((1, 1), (3, 0)),    # even output rows/cols (parity 0)
          ((0, 2), (2, 1)))    # odd  output rows/cols (parity 1)


def transposed_deconv(x, w, *, compute_dtype=jnp.bfloat16):
    """ConvTranspose2d forward, kernel 4, stride 2, padding 1, no bias.

    x: (B, C_in, H, W)        activations (NCHW, like PyTorch)
    w: (C_in, C_out, 4, 4)    PyTorch ConvTranspose2d weight layout
    returns (B, C_out, 2H, 2W) in x.dtype (matmuls run in bf16, f32 accum)
    """
    B, C_in, H, W = x.shape
    assert w.shape[0] == C_in and w.shape[2:] == (4, 4)
    C_out = w.shape[1]

    # Channel padding to multiples of 16 (bf16 sublane packing).
    C_in_p = _round_up(C_in, 16)
    C_out_p = _round_up(C_out, 16)
    Ct = _pick_cout_tile(C_out_p)           # C_out tile per grid step
    n_co = C_out_p // Ct

    Hp, Wp = H + 2, W + 2                   # 1-halo "content" grid
    P = Hp * Wp                             # flattened content size
    LP = _round_up(P, 128)                  # lane-dense compute width

    # Single fused pad (+ bf16 cast) producing the extended flat activation:
    #   rows: 3 zero rows on top (gives flat headroom for the dh-1/dw-1 shift),
    #         pad_bot zero rows at the bottom (halo + LP over-read headroom),
    #   cols: the usual 1/1 halo.  Content pixel (r, c) of the 1-halo grid
    #   lives at flat index base + r*Wp + c with base = 2*Wp, so every shifted
    #   view is a static, in-bounds lane offset and all out-of-content reads
    #   hit zero padding.
    pad_top = 3
    pad_bot = max(1, -(-(LP + 1) // Wp) - H)          # >= 3 always
    F = (H + pad_top + pad_bot) * Wp
    base = 2 * Wp

    x_ext = jnp.pad(x.astype(compute_dtype),
                    ((0, 0), (0, C_in_p - C_in), (pad_top, pad_bot), (1, 1)))
    x_ext = x_ext.reshape(B, C_in_p, F)

    # Per-parity fused weights: stack the 4 taps along the contraction axis in
    # the SAME order the kernel stacks the shifted activation views.
    w_t = jnp.transpose(w, (2, 3, 1, 0))              # (4, 4, C_out, C_in)
    w_t = jnp.pad(w_t, ((0, 0), (0, 0),
                        (0, C_out_p - C_out), (0, C_in_p - C_in)))
    rows = []
    for r_h in range(2):
        cols = []
        for r_w in range(2):
            taps = [w_t[kh, kw]
                    for kh, _ in _TERMS[r_h]
                    for kw, _ in _TERMS[r_w]]          # 4 x (C_out_p, C_in_p)
            cols.append(jnp.concatenate(taps, axis=1))  # (C_out_p, 4*C_in_p)
        rows.append(jnp.stack(cols, axis=0))
    w_par = jnp.stack(rows, axis=0).astype(compute_dtype)  # (2,2,Cop,4*Cip)

    def kernel(x_ref, w_ref, o_ref):
        for r_h in range(2):
            for r_w in range(2):
                # Load only the 4 shifted views this parity needs (static
                # lane offsets into the resident activation slab) and stack
                # them along the contraction axis.
                views = [x_ref[0, :, pl.ds(base + (dh - 1) * Wp + (dw - 1), LP)]
                         for _, dh in _TERMS[r_h]
                         for _, dw in _TERMS[r_w]]
                rhs = jnp.concatenate(views, axis=0)       # (4*C_in_p, LP)
                acc = jnp.dot(w_ref[r_h, r_w], rhs,
                              preferred_element_type=jnp.float32)
                o_ref[0, r_h, r_w] = acc.astype(o_ref.dtype)

    cd_size = jnp.dtype(compute_dtype).itemsize
    out_size = jnp.dtype(x.dtype).itemsize
    cost = pl.CostEstimate(
        flops=2 * B * 4 * C_out_p * (4 * C_in_p) * LP,
        transcendentals=0,
        bytes_accessed=int(x_ext.size * cd_size
                           + B * w_par.size * cd_size
                           + B * 4 * C_out_p * LP * out_size),
    )

    partial = pl.pallas_call(
        kernel,
        out_shape=jax.ShapeDtypeStruct((B, 2, 2, C_out_p, LP), x.dtype),
        grid_spec=pl.GridSpec(
            grid=(B, n_co),
            in_specs=[
                # Activation slab: depends only on b -> resident across co.
                pl.BlockSpec((1, C_in_p, F), lambda b, co: (b, 0, 0)),
                # Fused per-parity weights, tiled over C_out.
                pl.BlockSpec((2, 2, Ct, 4 * C_in_p),
                             lambda b, co: (0, 0, co, 0)),
            ],
            out_specs=pl.BlockSpec((1, 2, 2, Ct, LP),
                                   lambda b, co: (b, 0, 0, co, 0)),
        ),
        compiler_params=pltpu.CompilerParams(
            dimension_semantics=("parallel", "parallel"),
            vmem_limit_bytes=48 * 1024 * 1024),
        cost_estimate=cost,
    )(x_ext, w_par)

    # (B, 2, 2, C_out_p, LP) -> (B, C_out, 2H, 2W): crop channel/halo padding
    # and interleave the four parity planes (layout plumbing in XLA).
    partial = partial[:, :, :, :C_out, :P].reshape(B, 2, 2, C_out, Hp, Wp)
    partial = partial[:, :, :, :, 1:H + 1, 1:W + 1]    # (B, 2, 2, Co, H, W)
    y = jnp.transpose(partial, (0, 3, 4, 1, 5, 2))     # (B, Co, H, 2, W, 2)
    return y.reshape(B, C_out, 2 * H, 2 * W)
    # TODO(synk): for very large H*W add a spatial grid axis with
    # halo-overlapping windows (pl.Element / dynamic pl.ds into the resident
    # slab) so per-step blocks stay small on v7x's 64 MiB VMEM.
    # TODO(synk): the final crop + parity-interleave transpose is one extra
    # XLA HBM pass; fuse it with the consumer when embedding in a full model.


def transposed_deconv_ref(x, w):
    """Pure-JAX reference: zero-stuffed conv with the flipped/transposed kernel."""
    k, s, p = 4, 2, 1
    w_oihw = jnp.transpose(jnp.flip(w, axis=(2, 3)), (1, 0, 2, 3))
    return jax.lax.conv_general_dilated(
        x, w_oihw,
        window_strides=(1, 1),
        padding=[(k - 1 - p, k - 1 - p)] * 2,
        lhs_dilation=(s, s),
        dimension_numbers=("NCHW", "OIHW", "NCHW"),
        precision=jax.lax.Precision.HIGHEST,
    )


if __name__ == "__main__":
    key = jax.random.PRNGKey(0)
    kx, kw = jax.random.split(key)

    B, C_in, C_out, H, W = 2, 4, 8, 16, 16
    x = jax.random.normal(kx, (B, C_in, H, W), dtype=jnp.float32)
    w = 0.1 * jax.random.normal(kw, (C_in, C_out, 4, 4), dtype=jnp.float32)

    y = jax.block_until_ready(transposed_deconv(x, w))
    assert y.shape == (B, C_out, 2 * H, 2 * W), y.shape

    # Reference computed on bf16-rounded inputs: the kernel feeds the MXU the
    # same bf16 operands with f32 accumulation, so this comparison is tight.
    x_r = x.astype(jnp.bfloat16).astype(jnp.float32)
    w_r = w.astype(jnp.bfloat16).astype(jnp.float32)
    y_ref = transposed_deconv_ref(x_r, w_r)
    if not jnp.allclose(y, y_ref, rtol=2e-3, atol=2e-3):
        err = float(jnp.max(jnp.abs(y - y_ref)))
        raise AssertionError(f"mismatch vs reference, max abs err = {err}")

    print("KERNEL_OK")
</pallas_src>

<mosaic_0001>
module attributes {stable_mosaic.version = 11 : i64} {
  func.func @kernel(%arg0: i32, %arg1: i32, %arg2: memref<1x16x450xbf16, #tpu.memory_space<vmem>>, %arg3: memref<2x2x16x64xbf16, #tpu.memory_space<vmem>>, %arg4: memref<1x2x2x16x384xf32, #tpu.memory_space<vmem>>) attributes {dimension_semantics = [#tpu.dimension_semantics<parallel>, #tpu.dimension_semantics<parallel>], iteration_bounds = array<i64: 2, 1>, scalar_prefetch = 0 : i64, scratch_operands = 0 : i64, tpu.core_type = #tpu.core_type<tc>, window_params = [{transform_indices = @transform_0, window_bounds = array<i64: 1, 16, 450>}, {transform_indices = @transform_1, window_bounds = array<i64: 2, 2, 16, 64>}, {transform_indices = @transform_2, window_bounds = array<i64: 1, 2, 2, 16, 384>}]} {
    %c0 = arith.constant 0 : index
    %c0_0 = arith.constant 0 : index
    %c36 = arith.constant 36 : index
    %0 = vector.load %arg2[%c0, %c0_0, %c36] : memref<1x16x450xbf16, #tpu.memory_space<vmem>>, vector<1x16x384xbf16>
    %1 = vector.shape_cast %0 : vector<1x16x384xbf16> to vector<16x384xbf16>
    %c0_1 = arith.constant 0 : index
    %c0_2 = arith.constant 0 : index
    %c35 = arith.constant 35 : index
    %2 = vector.load %arg2[%c0_1, %c0_2, %c35] : memref<1x16x450xbf16, #tpu.memory_space<vmem>>, vector<1x16x384xbf16>
    %3 = vector.shape_cast %2 : vector<1x16x384xbf16> to vector<16x384xbf16>
    %c0_3 = arith.constant 0 : index
    %c0_4 = arith.constant 0 : index
    %c18 = arith.constant 18 : index
    %4 = vector.load %arg2[%c0_3, %c0_4, %c18] : memref<1x16x450xbf16, #tpu.memory_space<vmem>>, vector<1x16x384xbf16>
    %5 = vector.shape_cast %4 : vector<1x16x384xbf16> to vector<16x384xbf16>
    %c0_5 = arith.constant 0 : index
    %c0_6 = arith.constant 0 : index
    %c17 = arith.constant 17 : index
    %6 = vector.load %arg2[%c0_5, %c0_6, %c17] : memref<1x16x450xbf16, #tpu.memory_space<vmem>>, vector<1x16x384xbf16>
    %7 = vector.shape_cast %6 : vector<1x16x384xbf16> to vector<16x384xbf16>
    %8 = tpu.concatenate %1, %3, %5, %7 in 0 : vector<16x384xbf16>, vector<16x384xbf16>, vector<16x384xbf16>, vector<16x384xbf16> -> vector<64x384xbf16>
    %c0_7 = arith.constant 0 : index
    %c0_8 = arith.constant 0 : index
    %c0_9 = arith.constant 0 : index
    %c0_10 = arith.constant 0 : index
    %9 = vector.load %arg3[%c0_7, %c0_8, %c0_9, %c0_10] : memref<2x2x16x64xbf16, #tpu.memory_space<vmem>>, vector<1x1x16x64xbf16>
    %10 = vector.shape_cast %9 : vector<1x1x16x64xbf16> to vector<16x64xbf16>
    %cst = arith.constant dense<0.000000e+00> : vector<16x384xf32>
    %11 = tpu.matmul %10, %8, %cst {dimension_numbers = #tpu.dot_dimension_numbers<[1], [0], [0], [1], [0, 0, 1, 1], [], []>} : vector<16x64xbf16>, vector<64x384xbf16>, vector<16x384xf32> -> vector<16x384xf32>
    %c0_11 = arith.constant 0 : index
    %c0_12 = arith.constant 0 : index
    %c0_13 = arith.constant 0 : index
    %c0_14 = arith.constant 0 : index
    %c0_15 = arith.constant 0 : index
    %12 = vector.load %arg4[%c0_11, %c0_12, %c0_13, %c0_14, %c0_15] : memref<1x2x2x16x384xf32, #tpu.memory_space<vmem>>, vector<1x1x1x16x384xf32>
    %13 = vector.shape_cast %12 : vector<1x1x1x16x384xf32> to vector<16x384xf32>
    %14 = vector.shape_cast %11 : vector<16x384xf32> to vector<1x1x1x16x384xf32>
    tpu.vector_store %arg4[%c0_11, %c0_12, %c0_13, %c0_14, %c0_15], %14 {strides = array<i32>} : memref<1x2x2x16x384xf32, #tpu.memory_space<vmem>>, vector<1x1x1x16x384xf32>,
    %c0_16 = arith.constant 0 : index
    %c0_17 = arith.constant 0 : index
    %c37 = arith.constant 37 : index
    %15 = vector.load %arg2[%c0_16, %c0_17, %c37] : memref<1x16x450xbf16, #tpu.memory_space<vmem>>, vector<1x16x384xbf16>
    %16 = vector.shape_cast %15 : vector<1x16x384xbf16> to vector<16x384xbf16>
    %c0_18 = arith.constant 0 : index
    %c0_19 = arith.constant 0 : index
    %c36_20 = arith.constant 36 : index
    %17 = vector.load %arg2[%c0_18, %c0_19, %c36_20] : memref<1x16x450xbf16, #tpu.memory_space<vmem>>, vector<1x16x384xbf16>
    %18 = vector.shape_cast %17 : vector<1x16x384xbf16> to vector<16x384xbf16>
    %c0_21 = arith.constant 0 : index
    %c0_22 = arith.constant 0 : index
    %c19 = arith.constant 19 : index
    %19 = vector.load %arg2[%c0_21, %c0_22, %c19] : memref<1x16x450xbf16, #tpu.memory_space<vmem>>, vector<1x16x384xbf16>
    %20 = vector.shape_cast %19 : vector<1x16x384xbf16> to vector<16x384xbf16>
    %c0_23 = arith.constant 0 : index
    %c0_24 = arith.constant 0 : index
    %c18_25 = arith.constant 18 : index
    %21 = vector.load %arg2[%c0_23, %c0_24, %c18_25] : memref<1x16x450xbf16, #tpu.memory_space<vmem>>, vector<1x16x384xbf16>
    %22 = vector.shape_cast %21 : vector<1x16x384xbf16> to vector<16x384xbf16>
    %23 = tpu.concatenate %16, %18, %20, %22 in 0 : vector<16x384xbf16>, vector<16x384xbf16>, vector<16x384xbf16>, vector<16x384xbf16> -> vector<64x384xbf16>
    %c0_26 = arith.constant 0 : index
    %c1 = arith.constant 1 : index
    %c0_27 = arith.constant 0 : index
    %c0_28 = arith.constant 0 : index
    %24 = vector.load %arg3[%c0_26, %c1, %c0_27, %c0_28] : memref<2x2x16x64xbf16, #tpu.memory_space<vmem>>, vector<1x1x16x64xbf16>
    %25 = vector.shape_cast %24 : vector<1x1x16x64xbf16> to vector<16x64xbf16>
    %cst_29 = arith.constant dense<0.000000e+00> : vector<16x384xf32>
    %26 = tpu.matmul %25, %23, %cst_29 {dimension_numbers = #tpu.dot_dimension_numbers<[1], [0], [0], [1], [0, 0, 1, 1], [], []>} : vector<16x64xbf16>, vector<64x384xbf16>, vector<16x384xf32> -> vector<16x384xf32>
    %c0_30 = arith.constant 0 : index
    %c0_31 = arith.constant 0 : index
    %c1_32 = arith.constant 1 : index
    %c0_33 = arith.constant 0 : index
    %c0_34 = arith.constant 0 : index
    %27 = vector.load %arg4[%c0_30, %c0_31, %c1_32, %c0_33, %c0_34] : memref<1x2x2x16x384xf32, #tpu.memory_space<vmem>>, vector<1x1x1x16x384xf32>
    %28 = vector.shape_cast %27 : vector<1x1x1x16x384xf32> to vector<16x384xf32>
    %29 = vector.shape_cast %26 : vector<16x384xf32> to vector<1x1x1x16x384xf32>
    tpu.vector_store %arg4[%c0_30, %c0_31, %c1_32, %c0_33, %c0_34], %29 {strides = array<i32>} : memref<1x2x2x16x384xf32, #tpu.memory_space<vmem>>, vector<1x1x1x16x384xf32>,
    %c0_35 = arith.constant 0 : index
    %c0_36 = arith.constant 0 : index
    %c54 = arith.constant 54 : index
    %30 = vector.load %arg2[%c0_35, %c0_36, %c54] : memref<1x16x450xbf16, #tpu.memory_space<vmem>>, vector<1x16x384xbf16>
    %31 = vector.shape_cast %30 : vector<1x16x384xbf16> to vector<16x384xbf16>
    %c0_37 = arith.constant 0 : index
    %c0_38 = arith.constant 0 : index
    %c53 = arith.constant 53 : index
    %32 = vector.load %arg2[%c0_37, %c0_38, %c53] : memref<1x16x450xbf16, #tpu.memory_space<vmem>>, vector<1x16x384xbf16>
    %33 = vector.shape_cast %32 : vector<1x16x384xbf16> to vector<16x384xbf16>
    %c0_39 = arith.constant 0 : index
    %c0_40 = arith.constant 0 : index
    %c36_41 = arith.constant 36 : index
    %34 = vector.load %arg2[%c0_39, %c0_40, %c36_41] : memref<1x16x450xbf16, #tpu.memory_space<vmem>>, vector<1x16x384xbf16>
    %35 = vector.shape_cast %34 : vector<1x16x384xbf16> to vector<16x384xbf16>
    %c0_42 = arith.constant 0 : index
    %c0_43 = arith.constant 0 : index
    %c35_44 = arith.constant 35 : index
    %36 = vector.load %arg2[%c0_42, %c0_43, %c35_44] : memref<1x16x450xbf16, #tpu.memory_space<vmem>>, vector<1x16x384xbf16>
    %37 = vector.shape_cast %36 : vector<1x16x384xbf16> to vector<16x384xbf16>
    %38 = tpu.concatenate %31, %33, %35, %37 in 0 : vector<16x384xbf16>, vector<16x384xbf16>, vector<16x384xbf16>, vector<16x384xbf16> -> vector<64x384xbf16>
    %c1_45 = arith.constant 1 : index
    %c0_46 = arith.constant 0 : index
    %c0_47 = arith.constant 0 : index
    %c0_48 = arith.constant 0 : index
    %39 = vector.load %arg3[%c1_45, %c0_46, %c0_47, %c0_48] : memref<2x2x16x64xbf16, #tpu.memory_space<vmem>>, vector<1x1x16x64xbf16>
    %40 = vector.shape_cast %39 : vector<1x1x16x64xbf16> to vector<16x64xbf16>
    %cst_49 = arith.constant dense<0.000000e+00> : vector<16x384xf32>
    %41 = tpu.matmul %40, %38, %cst_49 {dimension_numbers = #tpu.dot_dimension_numbers<[1], [0], [0], [1], [0, 0, 1, 1], [], []>} : vector<16x64xbf16>, vector<64x384xbf16>, vector<16x384xf32> -> vector<16x384xf32>
    %c0_50 = arith.constant 0 : index
    %c1_51 = arith.constant 1 : index
    %c0_52 = arith.constant 0 : index
    %c0_53 = arith.constant 0 : index
    %c0_54 = arith.constant 0 : index
    %42 = vector.load %arg4[%c0_50, %c1_51, %c0_52, %c0_53, %c0_54] : memref<1x2x2x16x384xf32, #tpu.memory_space<vmem>>, vector<1x1x1x16x384xf32>
    %43 = vector.shape_cast %42 : vector<1x1x1x16x384xf32> to vector<16x384xf32>
    %44 = vector.shape_cast %41 : vector<16x384xf32> to vector<1x1x1x16x384xf32>
    tpu.vector_store %arg4[%c0_50, %c1_51, %c0_52, %c0_53, %c0_54], %44 {strides = array<i32>} : memref<1x2x2x16x384xf32, #tpu.memory_space<vmem>>, vector<1x1x1x16x384xf32>,
    %c0_55 = arith.constant 0 : index
    %c0_56 = arith.constant 0 : index
    %c55 = arith.constant 55 : index
    %45 = vector.load %arg2[%c0_55, %c0_56, %c55] : memref<1x16x450xbf16, #tpu.memory_space<vmem>>, vector<1x16x384xbf16>
    %46 = vector.shape_cast %45 : vector<1x16x384xbf16> to vector<16x384xbf16>
    %c0_57 = arith.constant 0 : index
    %c0_58 = arith.constant 0 : index
    %c54_59 = arith.constant 54 : index
    %47 = vector.load %arg2[%c0_57, %c0_58, %c54_59] : memref<1x16x450xbf16, #tpu.memory_space<vmem>>, vector<1x16x384xbf16>
    %48 = vector.shape_cast %47 : vector<1x16x384xbf16> to vector<16x384xbf16>
    %c0_60 = arith.constant 0 : index
    %c0_61 = arith.constant 0 : index
    %c37_62 = arith.constant 37 : index
    %49 = vector.load %arg2[%c0_60, %c0_61, %c37_62] : memref<1x16x450xbf16, #tpu.memory_space<vmem>>, vector<1x16x384xbf16>
    %50 = vector.shape_cast %49 : vector<1x16x384xbf16> to vector<16x384xbf16>
    %c0_63 = arith.constant 0 : index
    %c0_64 = arith.constant 0 : index
    %c36_65 = arith.constant 36 : index
    %51 = vector.load %arg2[%c0_63, %c0_64, %c36_65] : memref<1x16x450xbf16, #tpu.memory_space<vmem>>, vector<1x16x384xbf16>
    %52 = vector.shape_cast %51 : vector<1x16x384xbf16> to vector<16x384xbf16>
    %53 = tpu.concatenate %46, %48, %50, %52 in 0 : vector<16x384xbf16>, vector<16x384xbf16>, vector<16x384xbf16>, vector<16x384xbf16> -> vector<64x384xbf16>
    %c1_66 = arith.constant 1 : index
    %c1_67 = arith.constant 1 : index
    %c0_68 = arith.constant 0 : index
    %c0_69 = arith.constant 0 : index
    %54 = vector.load %arg3[%c1_66, %c1_67, %c0_68, %c0_69] : memref<2x2x16x64xbf16, #tpu.memory_space<vmem>>, vector<1x1x16x64xbf16>
    %55 = vector.shape_cast %54 : vector<1x1x16x64xbf16> to vector<16x64xbf16>
    %cst_70 = arith.constant dense<0.000000e+00> : vector<16x384xf32>
    %56 = tpu.matmul %55, %53, %cst_70 {dimension_numbers = #tpu.dot_dimension_numbers<[1], [0], [0], [1], [0, 0, 1, 1], [], []>} : vector<16x64xbf16>, vector<64x384xbf16>, vector<16x384xf32> -> vector<16x384xf32>
    %c0_71 = arith.constant 0 : index
    %c1_72 = arith.constant 1 : index
    %c1_73 = arith.constant 1 : index
    %c0_74 = arith.constant 0 : index
    %c0_75 = arith.constant 0 : index
    %57 = vector.load %arg4[%c0_71, %c1_72, %c1_73, %c0_74, %c0_75] : memref<1x2x2x16x384xf32, #tpu.memory_space<vmem>>, vector<1x1x1x16x384xf32>
    %58 = vector.shape_cast %57 : vector<1x1x1x16x384xf32> to vector<16x384xf32>
    %59 = vector.shape_cast %56 : vector<16x384xf32> to vector<1x1x1x16x384xf32>
    tpu.vector_store %arg4[%c0_71, %c1_72, %c1_73, %c0_74, %c0_75], %59 {strides = array<i32>} : memref<1x2x2x16x384xf32, #tpu.memory_space<vmem>>, vector<1x1x1x16x384xf32>,
    return
  }
  func.func @transform_0(%arg0: i32, %arg1: i32) -> (i32, i32, i32) {
    %c0_i32 = arith.constant 0 : i32
    %c0_i32_0 = arith.constant 0 : i32
    %c0_i32_1 = arith.constant 0 : i32
    return %arg0, %c0_i32, %c0_i32_0 : i32, i32, i32
  }
  func.func @transform_1(%arg0: i32, %arg1: i32) -> (i32, i32, i32, i32) {
    %c0_i32 = arith.constant 0 : i32
    %c0_i32_0 = arith.constant 0 : i32
    %c0_i32_1 = arith.constant 0 : i32
    %c0_i32_2 = arith.constant 0 : i32
    return %c0_i32, %c0_i32_0, %arg1, %c0_i32_1 : i32, i32, i32, i32
  }
  func.func @transform_2(%arg0: i32, %arg1: i32) -> (i32, i32, i32, i32, i32) {
    %c0_i32 = arith.constant 0 : i32
    %c0_i32_0 = arith.constant 0 : i32
    %c0_i32_1 = arith.constant 0 : i32
    %c0_i32_2 = arith.constant 0 : i32
    return %arg0, %c0_i32, %c0_i32_0, %arg1, %c0_i32_1 : i32, i32, i32, i32, i32
  }
}

</mosaic_0001>

<bundles_post_ra>
// kernel: tpu_custom_call.1
= control target key start
LH: loop header
LB: loop body
LE: loop exit
PB: predicated region body
PF: predicated region fallthrough
CT: control target
= control target key end

     0   :  { %7 = vsyncpa [#allocation3], 0  ;;  %s2126_s0 = inlined_call_operand.hbm [shape: bf16[2,16,450], index: 0, kind: input, shape index: {}]   ;;  %s2127_s1 = inlined_call_operand.hbm [shape: bf16[2,2,16,64], index: 1, kind: input, shape index: {}]   ;;  %s2128_s2 = inlined_call_operand.hbm [shape: f32[2,2,2,16,384], index: 2, kind: output, shape index: {}]  }
   0x1   :  { %9 = vsyncpa [#allocation3 + $0x1], 0 }
   0x2   :  { %10 = vsyncpa [#allocation6], 0 }
   0x3   :  { %11 = vsyncpa [#allocation4], 0 }
   0x4   :  { %13 = vsyncpa [#allocation4 + $0x1], 0  ;;  %s1575_s9 = smov 0   ;;  %s1577_s10 = smov 0  }
   0x5   :  { %s1579_s11 = smov 0   ;;  %s1581_s12 = smov 0  }
   0x6   :  { %s1583_s13 = smov 0   ;;  %s1585_s14 = smov 0  }
   0x7 LB: > { %s1165_s15 = sadd.s32 4294967295, %s1539_s14   ;;  %s1166_s16 = sadd.s32 4294967294, %s1539_s14   ;;  %s1539_s14 = sphi %s1585_s14, %s19_s14   ;;  %s1535_s13 = sphi %s1583_s13, %s2152_s13   ;;  %s1531_s12 = sphi %s1581_s12, %s2151_s12   ;;  %s1527_s11 = sphi %s1579_s11, %s2150_s11   ;;  %s1523_s10 = sphi %s1577_s10, %s2149_s10   ;;  %s1519_s9 = sphi %s1575_s9, %s2148_s9  }
   0x8   : > { %p51_p0 = scmp.ne.s32.totalorder %s1523_s10, %s1519_s9  ;;  %p1609_p1 = scmp.eq.s32.totalorder %s1165_s15, 0 }
   0x9   : > { %p1613_p2 = scmp.eq.s32.totalorder %s1165_s15, 1  ;;  %p109_p3 = scmp.eq.s32.totalorder %s1166_s16, 1 }
   0xa   : > { %s2133_s17 = scalar_select %p1609_p1, 1, 0 }
   0xb   : > { %s2134_s18 = scalar_select %p1613_p2, 1, 0 }
   0xc   : > { %p1619_p4 = por %p1609_p1, %p51_p0  ;;  %p1167_p5 = scmp.ge.s32.totalorder %s1539_s14, 1 }
   0xd   : > { %p1624_p6 = por %p109_p3, %p51_p0  ;;  %p116_p7 = scmp.lt.s32.totalorder %s1539_s14, 3 }
   0xe   : > { %s2135_s19 = scalar_select %p1619_p4, 1, 0 }
   0xf   : > { %s2136_s20 = scalar_select %p1624_p6, 1, 0 }
  0x10   : > { %p1629_p8 = pnand %p1167_p5, %p116_p7  ;;  %s1541_s22 = smov [#allocation5]  }
  0x11   : > { %s131_s23 = sshll.u32 %s1541_s22, 4  ;;  %s31_s25 = sadd.s32 1, %s1535_s13  ;;  %s132_s23 = int_to_ptr.vmem [resolvable:$true] %s131_s23 }
  0x12   : > { %s2137_s21 = scalar_select %p1629_p8, 1, 0 }
  0x13   : > { %p1304_p9 = pneg %p1629_p8  ;;  %s1395_s28 = scalar_lea.hbm %s2127_s1, 512 }
  0x14   : > { %p1396_p12 = scmp.ne.s32.totalorder %s2127_s1, %s1395_s28  ;;  %p1402_p5 = scmp.lt.u32.totalorder %s1395_s28, %s2127_s1 }
  0x15   : > { %p1638_p11 = pnand %p1304_p9, %p1609_p1 }
  0x17   : > { %p1397_p13 = pneg %p1638_p11 }
  0x19   : > { %p1398_p0 = pnand %p1397_p13, %p1396_p12 }
  0x1b   : > { %p1399_p3 = pneg %p1398_p0 }
  0x1d   : > { %p1404_p7 = pnand %p1402_p5, %p1399_p3 }
  0x1f   : > { %1407 = shalt.err (!%p1404_p7)
}
  0x20   : > { %s1408_s5 = scalar_lea.vmem %s132_s23, 512  ;;  %p1416_p1 = scmp.lt.s32.totalorder %s132_s23, %s132_s23 }
  0x21   : > { %p1409_p9 = scmp.ne.s32.totalorder %s132_s23, %s1408_s5  ;;  %p1417_p4 = scmp.lt.s32.totalorder %s1408_s5, %s1408_s5 }
  0x23   : > { %p1411_p10 = pnand %p1409_p9, %p1397_p13  ;;  %p1418_p8 = por %p1417_p4, %p1416_p1 }
  0x25   : > { %p1412_p6 = pneg %p1411_p10 }
  0x27   : > { %p1419_p2 = pnand %p1418_p8, %p1412_p6 }
  0x29   : > { %1422 = shalt.err (!%p1419_p2)
}
  0x2a   : > { %s1542_s6 = smov 64   ;;  %s1543_s7 = smov 4  }
  0x2b   : > { %1307 = dma.hbm_to_vmem [thread:$0]  (!%p1638_p11), %s2127_s1, 512, %s132_s23, [#allocation6], %s1542_s6, %s1542_s6, %s1543_s7  }
  0x2c   : > { %p33_p1 = scmp.ge.s32.totalorder %s31_s25, 2  ;;  %s38_s16 = sadd.s32 1, %s1527_s11 }
  0x2d   : > { %p45_p2 = scmp.ne.s32.totalorder %s1527_s11, %s1523_s10  ;;  %p46_p4 = scmp.eq.s32.totalorder %s1539_s14, 0 }
  0x2e   : > { %s2154_s25 = smov (%p33_p1, %s31_s25), 0  ;;  %p2140_p8 = scmp.ne.s32.totalorder %s2134_s18, 0 }
  0x2f   : > { %p1665_p6 = por %p46_p4, %p45_p2  ;;  %s35_s24 = ssub.s32 %s1535_s13, %s2154_s25 }
  0x30   : > { %p1671_p10 = por %p2140_p8, %p45_p2  ;;  %p1317_p12 = scmp.lt.s32.totalorder %s1539_s14, 2 }
  0x31   : > { %p36_p11 = scmp.eq.s32.totalorder %s35_s24, 0  ;;  %s145_s23 = sand.u32 1, %s1527_s11  }
  0x32   : > { %s1170_s27 = sshll.u32 %s145_s23, 5  ;;  %s1225_s29 = sshll.u32 %s1535_s13, 9 }
  0x33   : > { %s1680_s28 = scalar_select %p36_p11, %s1527_s11, %s38_s16  }
  0x34   : > { %s1686_s4 = scalar_lea.hbm %s2126_s0, %s1225_s29  ;;  %s149_s18 = scalar_lea.vmem [#allocation2], %s1170_s27 }
  0x35   : > { %s156_s5 = sshll.u32 %s149_s18, 4  ;;  %p1692_p13 = pnand %p1317_p12, %p1665_p6  ;;  %s1688_s5 = int_to_ptr.vmem [resolvable:$true] %s156_s5 }
  0x36   : > { %s1696_s7 = scalar_lea.sflag [#allocation3], %s145_s23  ;;  %s1423_s8 = scalar_lea.hbm %s1686_s4, 512 }
  0x37   : > { %p1424_p0 = scmp.ne.s32.totalorder %s1686_s4, %s1423_s8  ;;  %p1425_p3 = pneg %p1692_p13 }
  0x38   : > { %s1428_s22 = scalar_lea.hbm %s2126_s0, 1024  ;;  %p1429_p9 = scmp.lt.u32.totalorder %s1686_s4, %s2126_s0 }
  0x39   : > { %p1426_p5 = pnand %p1425_p3, %p1424_p0  ;;  %p1430_p1 = scmp.lt.u32.totalorder %s1428_s22, %s1423_s8 }
  0x3a   : > { %p1432_p4 = scmp.lt.u32.totalorder %s1423_s8, %s1686_s4 }
  0x3b   : > { %p1427_p7 = pneg %p1426_p5  ;;  %p1431_p2 = por %p1430_p1, %p1429_p9 }
  0x3d   : > { %p1433_p6 = por %p1432_p4, %p1431_p2 }
  0x3f   : > { %p1434_p8 = pnand %p1433_p6, %p1427_p7 }
  0x41   : > { %1437 = shalt.err (!%p1434_p8)
}
  0x42   : > { %s1438_s23 = scalar_lea.vmem %s1688_s5, 512  ;;  %s1544_s29 = smov [#allocation2]  }
  0x43   : > { %p1439_p12 = scmp.ne.s32.totalorder %s1688_s5, %s1438_s23  ;;  %s1443_s30 = sshll.u32 %s1544_s29, 4  ;;  %s1444_s30 = int_to_ptr.vmem [resolvable:$false] %s1443_s30 }
  0x44   : > { %s1445_s3 = scalar_lea.vmem %s1444_s30, 1024  ;;  %p1446_p5 = scmp.lt.s32.totalorder %s1688_s5, %s1444_s30 }
  0x45   : > { %p1441_p11 = pnand %p1439_p12, %p1425_p3  ;;  %p1447_p9 = scmp.lt.s32.totalorder %s1445_s3, %s1438_s23 }
  0x47   : > { %p1442_p0 = pneg %p1441_p11  ;;  %p1448_p1 = por %p1447_p9, %p1446_p5 }
  0x49   : > { %p1449_p2 = pnand %p1448_p1, %p1442_p0 }
  0x4b   : > { %1452 = shalt.err (!%p1449_p2)
}
  0x4c   : > { %s1545_s18 = smov 256   ;;  %s1546_s8 = smov 16  }
  0x4d   : > { %1311 = dma.hbm_to_vmem [thread:$0]  (!%p1692_p13), %s1686_s4, 512, %s1688_s5, %s1696_s7, %s1545_s18, %s1545_s18, %s1546_s8  }
  0x4e   : > { %p2143_p3 = scmp.ne.s32.totalorder %s2137_s21, 0 }
  0x4f   : > { %s1727_s15 = sand.u32 (!%p2143_p3), 1, %s1523_s10   ;;  %p2144_p7 = scmp.ne.s32.totalorder (!%p2143_p3), %s2135_s19, 0 }
  0x50   : > { %168 = sbr.rel (%p2143_p3) target bundleno = 681 (0x2a9), region = 28  ;;  %s1174_s16 = sshll.u32 (!%p2143_p3), %s1727_s15, 5 }
  0x51   : > { %s171_s22 = scalar_lea.sflag (!%p2143_p3), [#allocation3], %s1727_s15  ;;  %s174_s24 = scalar_lea.vmem (!%p2143_p3), [#allocation2], %s1174_s16 }
  0x57   : > { %1506 = dma.done.wait (%p2144_p7), %s171_s22, 512  }
  0x58   : > { %1508 = vsyncadd (%p2144_p7), %s171_s22, 4294966784  ;;  %p2145_p4 = scmp.ne.s32.totalorder %s2133_s17, 0 }
  0x5a   : > { %1510 = dma.done.wait (%p2145_p4), [#allocation6], 512  }
  0x5b   : > { %1512 = vsyncadd (%p2145_p4), [#allocation6], 4294966784  ;;  %v1739_v0 = vld [vmem:[%s174_s24 + $0x8] ss:$16 sps:$4 sm:$0xff]   ;;  %v1741_v1 = vld [vmem:[%s174_s24] ss:$16 sps:$4 sm:$0xff]  }
  0x5c   : > { %s1547_s21 = smov 1   ;;  %v1745_v2 = vld [vmem:[%s174_s24 + $0xc] ss:$16 sps:$4 sm:$0xff]   ;;  %v1747_v3 = vld [vmem:[%s174_s24 + $0x4] ss:$16 sps:$4 sm:$0xff]   ;;  %s1548_s17 = smov 18  }
  0x5d   : > { %226 = vrot.lane.b32.xlu1 %v1739_v0, %s1547_s21  ;;  %222 = vrot.lane.b32.xlu0 %v1741_v1, %s1547_s21  ;;  %s1549_s19 = smov 19   ;;  %s1550_s4 = smov 92   ;;  %v1551_v4 = vmov 0.0   ;;  %vm230_vm0 = vcmask 7168   ;;  %vm242_vm1 = vcmask 146432   ;;  %vm254_vm2 = vcmask 154624  }
  0x5e   : > { %1246 = vmatprep.subr.bf16.mxu1 %v1551_v4  ;;  %vm1552_vm3 = vmmov 0   ;;  %v1553_v27 = vmov 0   ;;  %s1554_s5 = smov 91   ;;  %s1555_s6 = smov 74   ;;  %vm297_vm4 = vcmask 752640   ;;  %vm322_vm5 = vcmask 523264  }
  0x5f   : > { %1254 = vmatprep.mubr.msk.bf16.mxu1 %vm1552_vm3, %v1551_v4  ;;  %358 = vmatprep.mubr.bf16.mxu0 %v1553_v27  ;;  %s1556_s7 = smov 73   ;;  %vm509_vm6 = vcmask 744448   ;;  %vm721_vm7 = vcmask 605184   ;;  %vm933_vm8 = vcmask 596992   ;;  %s1294_s27 = smul.u32 192, %s1727_s15 }
  0x60   : > { %s1295_s29 = smul.u32 3072, %s1531_s12  ;;  %s1053_s12 = scalar_lea.sflag [#allocation4], %s1727_s15 }
  0x61   : > { %228 = vrot.lane.b32.xlu1 %v1745_v2, %s1547_s21  ;;  %224 = vrot.lane.b32.xlu0 %v1747_v3, %s1547_s21  ;;  %s2044_s23 = scalar_lea.vmem [#allocation7], %s1294_s27  ;;  %s1557_s22 = smov [#allocation7]  }
  0x62   : > { %s1069_s30 = sshll.u32 %s2044_s23, 4  ;;  %s2072_s8 = scalar_lea.hbm %s2128_s2, %s1295_s29  ;;  %s2074_s30 = int_to_ptr.vmem [resolvable:$true] %s1069_s30 }
  0x63   : > { %s1453_s16 = scalar_lea.vmem %s2074_s30, 3072  ;;  %s1457_s24 = sshll.u32 %s1557_s22, 4  ;;  %s1458_s24 = int_to_ptr.vmem [resolvable:$false] %s1457_s24 }
  0x64   : > { %p1454_p13 = scmp.ne.s32.totalorder %s2074_s30, %s1453_s16  ;;  %p1460_p12 = scmp.lt.s32.totalorder %s2074_s30, %s1458_s24 }
  0x65   : > { %236 = vrot.lane.b32.xlu1 %v1747_v3, %s1548_s17  ;;  %234 = vrot.lane.b32.xlu0 %v1741_v1, %s1548_s17 }
  0x66   : > { %p1455_p6 = pnand %p1454_p13, %p1671_p10 }
  0x68   : > { %p1456_p8 = pneg %p1455_p6 }
  0x69   : > { %240 = vrot.lane.b32.xlu1 %v1745_v2, %s1548_s17  ;;  %238 = vrot.lane.b32.xlu0 %v1739_v0, %s1548_s17 }
  0x6d   : > { %248 = vrot.lane.b32.xlu1 %v1747_v3, %s1549_s19  ;;  %246 = vrot.lane.b32.xlu0 %v1741_v1, %s1549_s19 }
  0x71   : > { %252 = vrot.lane.b32.xlu1 %v1745_v2, %s1549_s19  ;;  %250 = vrot.lane.b32.xlu0 %v1739_v0, %s1549_s19 }
  0x75   : > { %438 = vrot.lane.b32.xlu1 %v1747_v3, %s1547_s21  ;;  %436 = vrot.lane.b32.xlu0 %v1741_v1, %s1547_s21 }
  0x79   : > { %442 = vrot.lane.b32.xlu1 %v1745_v2, %s1547_s21  ;;  %440 = vrot.lane.b32.xlu0 %v1739_v0, %s1547_s21 }
  0x7d   : > { %449 = vrot.lane.b32.xlu1 %v1747_v3, %s1548_s17  ;;  %447 = vrot.lane.b32.xlu0 %v1741_v1, %s1548_s17 }
  0x81   : > { %453 = vrot.lane.b32.xlu1 %v1745_v2, %s1548_s17  ;;  %451 = vrot.lane.b32.xlu0 %v1739_v0, %s1548_s17 }
  0x85   : > { %460 = vrot.lane.b32.xlu1 %v1747_v3, %s1549_s19  ;;  %458 = vrot.lane.b32.xlu0 %v1741_v1, %s1549_s19 }
  0x89   : > { %464 = vrot.lane.b32.xlu1 %v1745_v2, %s1549_s19  ;;  %462 = vrot.lane.b32.xlu0 %v1739_v0, %s1549_s19 }
  0x8d   : > { %650 = vrot.lane.b32.xlu1 %v1747_v3, %s1547_s21  ;;  %648 = vrot.lane.b32.xlu0 %v1741_v1, %s1547_s21 }
  0x91   : > { %654 = vrot.lane.b32.xlu1 %v1745_v2, %s1547_s21  ;;  %652 = vrot.lane.b32.xlu0 %v1739_v0, %s1547_s21 }
  0x95   : > { %661 = vrot.lane.b32.xlu1 %v1747_v3, %s1548_s17  ;;  %659 = vrot.lane.b32.xlu0 %v1741_v1, %s1548_s17 }
  0x99   : > { %665 = vrot.lane.b32.xlu1 %v1745_v2, %s1548_s17  ;;  %663 = vrot.lane.b32.xlu0 %v1739_v0, %s1548_s17 }
  0x9d   : > { %672 = vrot.lane.b32.xlu1 %v1747_v3, %s1549_s19  ;;  %670 = vrot.lane.b32.xlu0 %v1741_v1, %s1549_s19 }
  0xa1   : > { %676 = vrot.lane.b32.xlu1 %v1745_v2, %s1549_s19  ;;  %674 = vrot.lane.b32.xlu0 %v1739_v0, %s1549_s19 }
  0xa5   : > { %862 = vrot.lane.b32.xlu1 %v1747_v3, %s1547_s21  ;;  %860 = vrot.lane.b32.xlu0 %v1741_v1, %s1547_s21 }
  0xa9   : > { %866 = vrot.lane.b32.xlu1 %v1745_v2, %s1547_s21  ;;  %864 = vrot.lane.b32.xlu0 %v1739_v0, %s1547_s21  ;;  %s1459_s21 = scalar_lea.vmem %s1458_s24, 6144 }
  0xaa   : > { %p1461_p11 = scmp.lt.s32.totalorder %s1459_s21, %s1453_s16 }
  0xac   : > { %p1462_p0 = por %p1461_p11, %p1460_p12 }
  0xad   : > { %873 = vrot.lane.b32.xlu1 %v1747_v3, %s1548_s17  ;;  %871 = vrot.lane.b32.xlu0 %v1741_v1, %s1548_s17 }
  0xae   : > { %p1463_p5 = pnand %p1462_p0, %p1456_p8 }
  0xb1   : > { %877 = vrot.lane.b32.xlu1 %v1745_v2, %s1548_s17  ;;  %875 = vrot.lane.b32.xlu0 %v1739_v0, %s1548_s17 }
  0xb5   : > { %269 = vrot.lane.b32.xlu1 %v1739_v0, %s1550_s4  ;;  %267 = vrot.lane.b32.xlu0 %v1747_v3, %s1550_s4 }
  0xb9   : > { %882 = vrot.lane.b32.xlu1 %v1741_v1, %s1549_s19  ;;  %265 = vrot.lane.b32.xlu0 %v1741_v1, %s1550_s4 }
  0xbd   : > { %886 = vrot.lane.b32.xlu1 %v1739_v0, %s1549_s19  ;;  %884 = vrot.lane.b32.xlu0 %v1747_v3, %s1549_s19 }
  0xc1   : > { %888 = vrot.lane.b32.xlu1 %v1745_v2, %s1549_s19  ;;  %271 = vrot.lane.b32.xlu0 %v1745_v2, %s1550_s4 }
  0xcf   : > { %v227_v5 = vpop.permute.xlu1 %226  ;;  %v223_v6 = vpop.permute.xlu0 %222 }
  0xd0   : > { %273 = vrot.lane.b32.xlu0 %v223_v6, %s1550_s4 }
  0xd3   : > { %v229_v7 = vpop.permute.xlu1 %228  ;;  %v225_v8 = vpop.permute.xlu0 %224 }
  0xd4   : > { %v232_v9 = vsel %vm230_vm0, %v225_v8, %v227_v5  ;;  %v233_v11 = vsel %vm230_vm0, %v227_v5, %v229_v7  ;;  %v231_v21 = vsel %vm230_vm0, %v223_v6, %v225_v8 }
  0xd5   : > { %277 = vrot.lane.b32.xlu1 %v232_v9, %s1550_s4 }
  0xd7   : > { %v237_v10 = vpop.permute.xlu1 %236  ;;  %v235_v12 = vpop.permute.xlu0 %234 }
  0xd8   : > { %281 = vrot.lane.b32.xlu0 %v235_v12, %s1550_s4  ;;  %v243_v25 = vsel %vm242_vm1, %v235_v12, %v237_v10 }
  0xd9   : > { %279 = vrot.lane.b32.xlu1 %v233_v11, %s1550_s4 }
  0xdb   : > { %v241_v13 = vpop.permute.xlu1 %240  ;;  %v239_v14 = vpop.permute.xlu0 %238 }
  0xdc   : > { %v244_v15 = vsel %vm242_vm1, %v237_v10, %v239_v14  ;;  %v245_v18 = vsel %vm242_vm1, %v239_v14, %v241_v13 }
  0xdd   : > { %285 = vrot.lane.b32.xlu1 %v244_v15, %s1550_s4 }
  0xdf   : > { %v249_v16 = vpop.permute.xlu1 %248  ;;  %v247_v17 = vpop.permute.xlu0 %246 }
  0xe0   : > { %289 = vrot.lane.b32.xlu0 %v247_v17, %s1550_s4  ;;  %v255_v29 = vsel %vm254_vm2, %v247_v17, %v249_v16 }
  0xe1   : > { %287 = vrot.lane.b32.xlu1 %v245_v18, %s1550_s4 }
  0xe3   : > { %v253_v19 = vpop.permute.xlu1 %252  ;;  %v251_v20 = vpop.permute.xlu0 %250 }
  0xe4   : > { %275 = vrot.lane.b32.xlu0 %v231_v21, %s1550_s4  ;;  %v256_v22 = vsel %vm254_vm2, %v249_v16, %v251_v20  ;;  %v257_v23 = vsel %vm254_vm2, %v251_v20, %v253_v19 }
  0xe5   : > { %293 = vrot.lane.b32.xlu1 %v256_v22, %s1550_s4 }
  0xe7   : > { %v439_v24 = vpop.permute.xlu1 %438  ;;  %v437_v26 = vpop.permute.xlu0 %436 }
  0xe8   : > { %283 = vrot.lane.b32.xlu0 %v243_v25, %s1550_s4  ;;  %v444_v38 = vsel %vm230_vm0, %v437_v26, %v439_v24 }
  0xe9   : > { %295 = vrot.lane.b32.xlu1 %v257_v23, %s1550_s4 }
  0xeb   : > { %v443_v28 = vpop.permute.xlu1 %442  ;;  %v441_v30 = vpop.permute.xlu0 %440 }
  0xec   : > { %291 = vrot.lane.b32.xlu0 %v255_v29, %s1550_s4  ;;  %v445_v33 = vsel %vm230_vm0, %v439_v24, %v441_v30  ;;  %v446_v36 = vsel %vm230_vm0, %v441_v30, %v443_v28 }
  0xed   : > { %481 = vrot.lane.b32.xlu1 %v1739_v0, %s1554_s5 }
  0xef   : > { %v450_v31 = vpop.permute.xlu1 %449  ;;  %v448_v32 = vpop.permute.xlu0 %447 }
  0xf0   : > { %479 = vrot.lane.b32.xlu0 %v1747_v3, %s1554_s5  ;;  %v455_v45 = vsel %vm242_vm1, %v448_v32, %v450_v31 }
  0xf1   : > { %483 = vrot.lane.b32.xlu1 %v1745_v2, %s1554_s5 }
  0xf3   : > { %v454_v34 = vpop.permute.xlu1 %453  ;;  %v452_v35 = vpop.permute.xlu0 %451 }
  0xf4   : > { %477 = vrot.lane.b32.xlu0 %v1741_v1, %s1554_s5  ;;  %v456_v40 = vsel %vm242_vm1, %v450_v31, %v452_v35  ;;  %v457_v43 = vsel %vm242_vm1, %v452_v35, %v454_v34 }
  0xf5   : > { %489 = vrot.lane.b32.xlu1 %v445_v33, %s1554_s5 }
  0xf7   : > { %v461_v37 = vpop.permute.xlu1 %460  ;;  %v459_v39 = vpop.permute.xlu0 %458 }
  0xf8   : > { %487 = vrot.lane.b32.xlu0 %v444_v38, %s1554_s5  ;;  %v466_v52 = vsel %vm254_vm2, %v459_v39, %v461_v37 }
  0xf9   : > { %491 = vrot.lane.b32.xlu1 %v446_v36, %s1554_s5 }
  0xfb   : > { %v465_v41 = vpop.permute.xlu1 %464  ;;  %v463_v42 = vpop.permute.xlu0 %462 }
  0xfc   : > { %485 = vrot.lane.b32.xlu0 %v437_v26, %s1554_s5  ;;  %v467_v47 = vsel %vm254_vm2, %v461_v37, %v463_v42  ;;  %v468_v50 = vsel %vm254_vm2, %v463_v42, %v465_v41 }
  0xfd   : > { %497 = vrot.lane.b32.xlu1 %v456_v40, %s1554_s5 }
  0xff   : > { %v651_v44 = vpop.permute.xlu1 %650  ;;  %v649_v46 = vpop.permute.xlu0 %648 }
 0x100   : > { %495 = vrot.lane.b32.xlu0 %v455_v45, %s1554_s5  ;;  %v656_v63 = vsel %vm230_vm0, %v649_v46, %v651_v44 }
 0x101   : > { %499 = vrot.lane.b32.xlu1 %v457_v43, %s1554_s5 }
 0x103   : > { %v655_v48 = vpop.permute.xlu1 %654  ;;  %v653_v49 = vpop.permute.xlu0 %652 }
 0x104   : > { %493 = vrot.lane.b32.xlu0 %v448_v32, %s1554_s5  ;;  %v657_v58 = vsel %vm230_vm0, %v651_v44, %v653_v49  ;;  %v658_v61 = vsel %vm230_vm0, %v653_v49, %v655_v48 }
 0x105   : > { %505 = vrot.lane.b32.xlu1 %v467_v47, %s1554_s5 }
 0x107   : > { %v662_v51 = vpop.permute.xlu1 %661  ;;  %v660_v53 = vpop.permute.xlu0 %659 }
 0x108   : > { %503 = vrot.lane.b32.xlu0 %v466_v52, %s1554_s5  ;;  %v667_v11 = vsel %vm242_vm1, %v660_v53, %v662_v51 }
 0x109   : > { %507 = vrot.lane.b32.xlu1 %v468_v50, %s1554_s5 }
 0x10b   : > { %v666_v54 = vpop.permute.xlu1 %665  ;;  %v664_v55 = vpop.permute.xlu0 %663 }
 0x10c   : > { %501 = vrot.lane.b32.xlu0 %v459_v39, %s1554_s5  ;;  %v668_v6 = vsel %vm242_vm1, %v662_v51, %v664_v55  ;;  %v669_v9 = vsel %vm242_vm1, %v664_v55, %v666_v54 }
 0x10d   : > { %693 = vrot.lane.b32.xlu1 %v1739_v0, %s1555_s6 }
 0x10f   : > { %v673_v56 = vpop.permute.xlu1 %672  ;;  %v671_v57 = vpop.permute.xlu0 %670 }
 0x110   : > { %691 = vrot.lane.b32.xlu0 %v1747_v3, %s1555_s6  ;;  %v678_v17 = vsel %vm254_vm2, %v671_v57, %v673_v56 }
 0x111   : > { %695 = vrot.lane.b32.xlu1 %v1745_v2, %s1555_s6 }
 0x113   : > { %v677_v59 = vpop.permute.xlu1 %676  ;;  %v675_v60 = vpop.permute.xlu0 %674 }
 0x114   : > { %689 = vrot.lane.b32.xlu0 %v1741_v1, %s1555_s6  ;;  %v679_v13 = vsel %vm254_vm2, %v673_v56, %v675_v60  ;;  %v680_v16 = vsel %vm254_vm2, %v675_v60, %v677_v59 }
 0x115   : > { %701 = vrot.lane.b32.xlu1 %v657_v58, %s1555_s6 }
 0x117   : > { %v863_v62 = vpop.permute.xlu1 %862  ;;  %v861_v5 = vpop.permute.xlu0 %860 }
 0x118   : > { %699 = vrot.lane.b32.xlu0 %v656_v63, %s1555_s6 }
 0x119   : > { %703 = vrot.lane.b32.xlu1 %v658_v61, %s1555_s6 }
 0x11b   : > { %v867_v7 = vpop.permute.xlu1 %866  ;;  %v865_v8 = vpop.permute.xlu0 %864 }
 0x11c   : > { %697 = vrot.lane.b32.xlu0 %v649_v46, %s1555_s6  ;;  %v869_v25 = vsel %vm230_vm0, %v863_v62, %v865_v8 }
 0x11d   : > { %709 = vrot.lane.b32.xlu1 %v668_v6, %s1555_s6 }
 0x11f   : > { %v874_v10 = vpop.permute.xlu1 %873  ;;  %v872_v12 = vpop.permute.xlu0 %871 }
 0x120   : > { %707 = vrot.lane.b32.xlu0 %v667_v11, %s1555_s6 }
 0x121   : > { %711 = vrot.lane.b32.xlu1 %v669_v9, %s1555_s6 }
 0x123   : > { %v878_v14 = vpop.permute.xlu1 %877  ;;  %v876_v15 = vpop.permute.xlu0 %875 }
 0x124   : > { %705 = vrot.lane.b32.xlu0 %v660_v53, %s1555_s6  ;;  %v880_v29 = vsel %vm242_vm1, %v874_v10, %v876_v15  ;;  %v881_v30 = vsel %vm242_vm1, %v876_v15, %v878_v14  ;;  %v1391_v53 = vld [vmem:[#allocation5] sm:$0xff]  }
 0x125   : > { %717 = vrot.lane.b32.xlu1 %v679_v13, %s1555_s6 }
 0x127   : > { %v268_v18 = vpop.permute.xlu0 %267  ;;  %v270_v19 = vpop.permute.xlu1 %269 }
 0x128   : > { %715 = vrot.lane.b32.xlu0 %v678_v17, %s1555_s6  ;;  %v299_v20 = vsel %vm297_vm4, %v268_v18, %v270_v19 }
 0x129   : > { %719 = vrot.lane.b32.xlu1 %v680_v16, %s1555_s6  ;;  %326 = vmatprep.subr.bf16.mxu0 %v299_v20 }
 0x12b   : > { %v266_v21 = vpop.permute.xlu0 %265  ;;  %v883_v28 = vpop.permute.xlu1 %882 }
 0x12c   : > { %713 = vrot.lane.b32.xlu0 %v671_v57, %s1555_s6  ;;  %v298_v22 = vsel %vm297_vm4, %v266_v21, %v268_v18 }
 0x12d   : > { %905 = vrot.lane.b32.xlu1 %v1739_v0, %s1556_s7  ;;  %327 = vmatpush1.bf16.msra.mxu0 %v298_v22  ;;  %v868_v0 = vsel %vm230_vm0, %v861_v5, %v863_v62 }
 0x12f   : > { %v885_v23 = vpop.permute.xlu0 %884 }
 0x130   : > { %903 = vrot.lane.b32.xlu0 %v1747_v3, %s1556_s7  ;;  %v870_v3 = vsel %vm230_vm0, %v865_v8, %v867_v7  ;;  %v890_v33 = vsel %vm254_vm2, %v883_v28, %v885_v23 }
 0x131   : > { %907 = vrot.lane.b32.xlu1 %v1745_v2, %s1556_s7  ;;  %v887_v2 = vpop.permute.xlu1 %886 }
 0x132   : > { %v891_v32 = vsel %vm254_vm2, %v885_v23, %v887_v2 }
 0x133   : > { %v272_v24 = vpop.permute.xlu0 %271 }
 0x134   : > { %901 = vrot.lane.b32.xlu0 %v1741_v1, %s1556_s7  ;;  %v300_v26 = vsel %vm297_vm4, %v270_v19, %v272_v24  ;;  %v879_v1 = vsel %vm242_vm1, %v872_v12, %v874_v10  ;;  %v1392_v24 = vld [vmem:[#allocation5 + $0x8] sm:$0xff]  }
 0x135   : > { %913 = vrot.lane.b32.xlu1 %v869_v25, %s1556_s7  ;;  %1247 = vmatpush3.bf16.msra.mxu1 %v300_v26  ;;  %v889_v31 = vpop.permute.xlu1 %888 }
 0x136   : > { %1248 = vmatprep.subr.bf16.mxu1 %v1551_v4  ;;  %v892_v35 = vsel %vm254_vm2, %v887_v2, %v889_v31 }
 0x138   : > { %911 = vrot.lane.b32.xlu0 %v868_v0, %s1556_s7 }
 0x139   : > { %915 = vrot.lane.b32.xlu1 %v870_v3, %s1556_s7 }
 0x13c   : > { %909 = vrot.lane.b32.xlu0 %v861_v5, %s1556_s7 }
 0x13d   : > { %921 = vrot.lane.b32.xlu1 %v880_v29, %s1556_s7 }
 0x140   : > { %919 = vrot.lane.b32.xlu0 %v879_v1, %s1556_s7 }
 0x141   : > { %923 = vrot.lane.b32.xlu1 %v881_v30, %s1556_s7 }
 0x142   : > { %v274_v36 = vpop.permute.xlu0 %273 }
 0x144   : > { %917 = vrot.lane.b32.xlu0 %v872_v12, %s1556_s7 }
 0x145   : > { %929 = vrot.lane.b32.xlu1 %v891_v32, %s1556_s7 }
 0x147   : > { %v278_v34 = vpop.permute.xlu1 %277 }
 0x148   : > { %927 = vrot.lane.b32.xlu0 %v890_v33, %s1556_s7 }
 0x149   : > { %931 = vrot.lane.b32.xlu1 %v892_v35, %s1556_s7 }
 0x14a   : > { %v282_v39 = vpop.permute.xlu0 %281 }
 0x14b   : > { %v280_v37 = vpop.permute.xlu1 %279 }
 0x14c   : > { %925 = vrot.lane.b32.xlu0 %v883_v28, %s1556_s7  ;;  %v303_v38 = vsel %vm297_vm4, %v278_v34, %v280_v37 }
 0x14d   : > { %1249 = vmatpush3.bf16.msra.mxu1 %v303_v38 }
 0x14e   : > { %1250 = vmatprep.subr.bf16.mxu1 %v1551_v4 }
 0x14f   : > { %v286_v40 = vpop.permute.xlu1 %285 }
 0x152   : > { %v290_v41 = vpop.permute.xlu0 %289 }
 0x153   : > { %v288_v42 = vpop.permute.xlu1 %287 }
 0x154   : > { %v306_v43 = vsel %vm297_vm4, %v286_v40, %v288_v42 }
 0x155   : > { %1251 = vmatpush3.bf16.msra.mxu1 %v306_v43 }
 0x156   : > { %v276_v44 = vpop.permute.xlu0 %275  ;;  %1252 = vmatprep.subr.bf16.mxu1 %v1551_v4 }
 0x157   : > { %v294_v45 = vpop.permute.xlu1 %293  ;;  %v302_v46 = vsel %vm297_vm4, %v276_v44, %v278_v34  ;;  %v301_v47 = vsel %vm297_vm4, %v274_v36, %v276_v44 }
 0x158   : > { %328 = vmatprep.subr.bf16.mxu0 %v302_v46 }
 0x159   : > { %329 = vmatpush1.bf16.msra.mxu0 %v301_v47 }
 0x15a   : > { %v284_v48 = vpop.permute.xlu0 %283 }
 0x15b   : > { %v296_v49 = vpop.permute.xlu1 %295  ;;  %v305_v50 = vsel %vm297_vm4, %v284_v48, %v286_v40  ;;  %v304_v51 = vsel %vm297_vm4, %v282_v39, %v284_v48 }
 0x15c   : > { %330 = vmatprep.subr.bf16.mxu0 %v305_v50  ;;  %v309_v52 = vsel %vm297_vm4, %v294_v45, %v296_v49  ;;  %v1393_v50 = vld [vmem:[#allocation5 + $0x10] sm:$0xff]  }
 0x15d   : > { %331 = vmatpush1.bf16.msra.mxu0 %v304_v51  ;;  %1253 = vmatpush3.bf16.msra.mxu1 %v309_v52 }
 0x15e   : > { %v292_v54 = vpop.permute.xlu0 %291  ;;  %1258 = vmatprep.subr.bf16.mxu1 %v1551_v4 }
 0x15f   : > { %v482_v55 = vpop.permute.xlu1 %481  ;;  %v308_v56 = vsel %vm297_vm4, %v292_v54, %v294_v45  ;;  %v307_v57 = vsel %vm297_vm4, %v290_v41, %v292_v54 }
 0x160   : > { %332 = vmatprep.subr.bf16.mxu0 %v308_v56  ;;  %1255 = vmatmul.mubr.msk.bf16.vlgmr.msra.gmra.mrb[0].mxu1 %vm322_vm5, %v1391_v53 }
 0x161   : > { %333 = vmatpush1.bf16.msra.mxu0 %v307_v57  ;;  %1266 = vmatprep.mubr.msk.bf16.mxu1 %vm1552_vm3, %v1551_v4 }
 0x162   : > { %v480_v58 = vpop.permute.xlu0 %479 }
 0x163   : > { %v484_v59 = vpop.permute.xlu1 %483  ;;  %v511_v60 = vsel %vm509_vm6, %v480_v58, %v482_v55 }
 0x164   : > { %v512_v61 = vsel %vm509_vm6, %v482_v55, %v484_v59  ;;  %537 = vmatprep.subr.bf16.mxu0 %v511_v60  ;;  %1181 = vmatmul.mubr.msk.bf16.vlgmr.msra.gmra.mrb[0].mxu0 %vm322_vm5, %v1391_v53 }
 0x165   : > { %1259 = vmatpush3.bf16.msra.mxu1 %v512_v61  ;;  %569 = vmatprep.mubr.bf16.mxu0 %v1553_v27 }
 0x166   : > { %v478_v62 = vpop.permute.xlu0 %477  ;;  %1260 = vmatprep.subr.bf16.mxu1 %v1551_v4 }
 0x167   : > { %v510_v63 = vsel %vm509_vm6, %v478_v62, %v480_v58  ;;  %v490_v5 = vpop.permute.xlu1 %489 }
 0x168   : > { %538 = vmatpush1.bf16.msra.mxu0 %v510_v63 }
 0x16a   : > { %v488_v6 = vpop.permute.xlu0 %487 }
 0x16b   : > { %v492_v7 = vpop.permute.xlu1 %491  ;;  %v514_v8 = vsel %vm509_vm6, %v488_v6, %v490_v5 }
 0x16c   : > { %v515_v9 = vsel %vm509_vm6, %v490_v5, %v492_v7  ;;  %539 = vmatprep.subr.bf16.mxu0 %v514_v8 }
 0x16d   : > { %1261 = vmatpush3.bf16.msra.mxu1 %v515_v9 }
 0x16e   : > { %v486_v10 = vpop.permute.xlu0 %485  ;;  %1262 = vmatprep.subr.bf16.mxu1 %v1551_v4 }
 0x16f   : > { %v513_v11 = vsel %vm509_vm6, %v486_v10, %v488_v6  ;;  %v498_v12 = vpop.permute.xlu1 %497 }
 0x170   : > { %540 = vmatpush1.bf16.msra.mxu0 %v513_v11 }
 0x172   : > { %v496_v13 = vpop.permute.xlu0 %495 }
 0x173   : > { %v500_v14 = vpop.permute.xlu1 %499  ;;  %v517_v15 = vsel %vm509_vm6, %v496_v13, %v498_v12 }
 0x174   : > { %v518_v16 = vsel %vm509_vm6, %v498_v12, %v500_v14  ;;  %541 = vmatprep.subr.bf16.mxu0 %v517_v15 }
 0x175   : > { %1263 = vmatpush3.bf16.msra.mxu1 %v518_v16 }
 0x176   : > { %v494_v17 = vpop.permute.xlu0 %493  ;;  %1264 = vmatprep.subr.bf16.mxu1 %v1551_v4 }
 0x177   : > { %v516_v18 = vsel %vm509_vm6, %v494_v17, %v496_v13  ;;  %v506_v19 = vpop.permute.xlu1 %505 }
 0x178   : > { %542 = vmatpush1.bf16.msra.mxu0 %v516_v18 }
 0x17a   : > { %v504_v20 = vpop.permute.xlu0 %503 }
 0x17b   : > { %v508_v21 = vpop.permute.xlu1 %507  ;;  %v520_v22 = vsel %vm509_vm6, %v504_v20, %v506_v19 }
 0x17c   : > { %v521_v23 = vsel %vm509_vm6, %v506_v19, %v508_v21  ;;  %543 = vmatprep.subr.bf16.mxu0 %v520_v22  ;;  %v1394_v19 = vld [vmem:[#allocation5 + $0x18] sm:$0xff]  }
 0x17d   : > { %1265 = vmatpush3.bf16.msra.mxu1 %v521_v23 }
 0x17e   : > { %v502_v25 = vpop.permute.xlu0 %501  ;;  %1270 = vmatprep.subr.bf16.mxu1 %v1551_v4 }
 0x17f   : > { %v519_v26 = vsel %vm509_vm6, %v502_v25, %v504_v20  ;;  %v694_v28 = vpop.permute.xlu1 %693 }
 0x180   : > { %544 = vmatpush1.bf16.msra.mxu0 %v519_v26  ;;  %1267 = vmatmul.mubr.msk.bf16.vlgmr.msra.gmra.mrb[4].mxu1 %vm322_vm5, %v1392_v24 }
 0x181   : > { %1278 = vmatprep.mubr.msk.bf16.mxu1 %vm1552_vm3, %v1551_v4 }
 0x182   : > { %v692_v0 = vpop.permute.xlu0 %691 }
 0x183   : > { %v696_v3 = vpop.permute.xlu1 %695  ;;  %v723_v2 = vsel %vm721_vm7, %v692_v0, %v694_v28  ;;  %1188 = vmatmul.mubr.msk.bf16.vlgmr.msra.gmra.mrb[4].mxu0 %vm322_vm5, %v1392_v24 }
 0x184   : > { %v724_v29 = vsel %vm721_vm7, %v694_v28, %v696_v3  ;;  %749 = vmatprep.subr.bf16.mxu0 %v723_v2  ;;  %781 = vmatprep.mubr.bf16.mxu0 %v1553_v27 }
 0x185   : > { %1271 = vmatpush3.bf16.msra.mxu1 %v724_v29 }
 0x186   : > { %v690_v1 = vpop.permute.xlu0 %689  ;;  %1272 = vmatprep.subr.bf16.mxu1 %v1551_v4 }
 0x187   : > { %v722_v30 = vsel %vm721_vm7, %v690_v1, %v692_v0  ;;  %v702_v31 = vpop.permute.xlu1 %701 }
 0x188   : > { %750 = vmatpush1.bf16.msra.mxu0 %v722_v30 }
 0x18a   : > { %v700_v32 = vpop.permute.xlu0 %699 }
 0x18b   : > { %v704_v33 = vpop.permute.xlu1 %703  ;;  %v726_v34 = vsel %vm721_vm7, %v700_v32, %v702_v31 }
 0x18c   : > { %v727_v35 = vsel %vm721_vm7, %v702_v31, %v704_v33  ;;  %751 = vmatprep.subr.bf16.mxu0 %v726_v34 }
 0x18d   : > { %1273 = vmatpush3.bf16.msra.mxu1 %v727_v35 }
 0x18e   : > { %v698_v36 = vpop.permute.xlu0 %697  ;;  %1274 = vmatprep.subr.bf16.mxu1 %v1551_v4 }
 0x18f   : > { %v725_v37 = vsel %vm721_vm7, %v698_v36, %v700_v32  ;;  %v710_v38 = vpop.permute.xlu1 %709 }
 0x190   : > { %752 = vmatpush1.bf16.msra.mxu0 %v725_v37 }
 0x192   : > { %v708_v39 = vpop.permute.xlu0 %707 }
 0x193   : > { %v712_v40 = vpop.permute.xlu1 %711  ;;  %v729_v41 = vsel %vm721_vm7, %v708_v39, %v710_v38 }
 0x194   : > { %v730_v42 = vsel %vm721_vm7, %v710_v38, %v712_v40  ;;  %753 = vmatprep.subr.bf16.mxu0 %v729_v41 }
 0x195   : > { %1275 = vmatpush3.bf16.msra.mxu1 %v730_v42 }
 0x196   : > { %v706_v43 = vpop.permute.xlu0 %705  ;;  %1276 = vmatprep.subr.bf16.mxu1 %v1551_v4 }
 0x197   : > { %v728_v44 = vsel %vm721_vm7, %v706_v43, %v708_v39  ;;  %v718_v45 = vpop.permute.xlu1 %717 }
 0x198   : > { %754 = vmatpush1.bf16.msra.mxu0 %v728_v44 }
 0x19a   : > { %v716_v46 = vpop.permute.xlu0 %715 }
 0x19b   : > { %v720_v47 = vpop.permute.xlu1 %719  ;;  %v732_v48 = vsel %vm721_vm7, %v716_v46, %v718_v45 }
 0x19c   : > { %v733_v49 = vsel %vm721_vm7, %v718_v45, %v720_v47  ;;  %755 = vmatprep.subr.bf16.mxu0 %v732_v48 }
 0x19d   : > { %1277 = vmatpush3.bf16.msra.mxu1 %v733_v49 }
 0x19e   : > { %v714_v51 = vpop.permute.xlu0 %713  ;;  %1282 = vmatprep.subr.bf16.mxu1 %v1551_v4 }
 0x19f   : > { %v731_v52 = vsel %vm721_vm7, %v714_v51, %v716_v46  ;;  %v906_v53 = vpop.permute.xlu1 %905 }
 0x1a0   : > { %756 = vmatpush1.bf16.msra.mxu0 %v731_v52  ;;  %1279 = vmatmul.mubr.msk.bf16.vlgmr.msra.gmra.mrb[8].mxu1 %vm322_vm5, %v1393_v50 }
 0x1a1   : > { %1290 = vmatprep.mubr.msk.bf16.mxu1 %vm1552_vm3, %v1551_v4 }
 0x1a2   : > { %v904_v54 = vpop.permute.xlu0 %903 }
 0x1a3   : > { %v908_v55 = vpop.permute.xlu1 %907  ;;  %v935_v56 = vsel %vm933_vm8, %v904_v54, %v906_v53  ;;  %1201 = vmatmul.mubr.msk.bf16.vlgmr.msra.gmra.mrb[8].mxu0 %vm322_vm5, %v1393_v50 }
 0x1a4   : > { %v936_v57 = vsel %vm933_vm8, %v906_v53, %v908_v55  ;;  %961 = vmatprep.subr.bf16.mxu0 %v935_v56  ;;  %993 = vmatprep.mubr.bf16.mxu0 %v1553_v27 }
 0x1a5   : > { %1283 = vmatpush3.bf16.msra.mxu1 %v936_v57 }
 0x1a6   : > { %v902_v58 = vpop.permute.xlu0 %901  ;;  %1284 = vmatprep.subr.bf16.mxu1 %v1551_v4 }
 0x1a7   : > { %v934_v59 = vsel %vm933_vm8, %v902_v58, %v904_v54  ;;  %v914_v60 = vpop.permute.xlu1 %913 }
 0x1a8   : > { %962 = vmatpush1.bf16.msra.mxu0 %v934_v59 }
 0x1aa   : > { %v912_v61 = vpop.permute.xlu0 %911 }
 0x1ab   : > { %v916_v62 = vpop.permute.xlu1 %915  ;;  %v938_v63 = vsel %vm933_vm8, %v912_v61, %v914_v60 }
 0x1ac   : > { %v939_v5 = vsel %vm933_vm8, %v914_v60, %v916_v62  ;;  %963 = vmatprep.subr.bf16.mxu0 %v938_v63 }
 0x1ad   : > { %1285 = vmatpush3.bf16.msra.mxu1 %v939_v5 }
 0x1ae   : > { %v910_v6 = vpop.permute.xlu0 %909  ;;  %1286 = vmatprep.subr.bf16.mxu1 %v1551_v4 }
 0x1af   : > { %v937_v27 = vsel %vm933_vm8, %v910_v6, %v912_v61  ;;  %v922_v7 = vpop.permute.xlu1 %921 }
 0x1b0   : > { %964 = vmatpush1.bf16.msra.mxu0 %v937_v27 }
 0x1b2   : > { %v920_v8 = vpop.permute.xlu0 %919 }
 0x1b3   : > { %v924_v9 = vpop.permute.xlu1 %923  ;;  %v941_v10 = vsel %vm933_vm8, %v920_v8, %v922_v7 }
 0x1b4   : > { %v942_v11 = vsel %vm933_vm8, %v922_v7, %v924_v9  ;;  %965 = vmatprep.subr.bf16.mxu0 %v941_v10 }
 0x1b5   : > { %1287 = vmatpush3.bf16.msra.mxu1 %v942_v11 }
 0x1b6   : > { %v918_v12 = vpop.permute.xlu0 %917  ;;  %1288 = vmatprep.subr.bf16.mxu1 %v1551_v4 }
 0x1b7   : > { %v940_v13 = vsel %vm933_vm8, %v918_v12, %v920_v8  ;;  %v930_v14 = vpop.permute.xlu1 %929 }
 0x1b8   : > { %966 = vmatpush1.bf16.msra.mxu0 %v940_v13 }
 0x1ba   : > { %v928_v15 = vpop.permute.xlu0 %927 }
 0x1bb   : > { %v932_v16 = vpop.permute.xlu1 %931  ;;  %v944_v17 = vsel %vm933_vm8, %v928_v15, %v930_v14 }
 0x1bc   : > { %v945_v18 = vsel %vm933_vm8, %v930_v14, %v932_v16  ;;  %967 = vmatprep.subr.bf16.mxu0 %v944_v17 }
 0x1bd   : > { %1289 = vmatpush3.bf16.msra.mxu1 %v945_v18 }
 0x1be   : > { %v926_v20 = vpop.permute.xlu0 %925 }
 0x1bf   : > { %v943_v21 = vsel %vm933_vm8, %v926_v20, %v928_v15 }
 0x1c0   : > { %968 = vmatpush1.bf16.msra.mxu0 %v943_v21  ;;  %1291 = vmatmul.mubr.msk.bf16.vlgmr.msra.gmra.mrb[12].mxu1 %vm322_vm5, %v1394_v19 }
 0x1c3   : > { %1214 = vmatmul.mubr.msk.bf16.vlgmr.msra.gmra.mrb[12].mxu0 %vm322_vm5, %v1394_v19 }
 0x233   : > { %v403_v4 = vpop.f32.mrb[0].mxu1 }
 0x234   : > { %412 = vst [vmem:[%s2044_s23 + $0x10] sm:$0xff] %v403_v4  ;;  %v1256_v22 = vpop.f32.mrb[1].mxu1 }
 0x235   : > { %v406_v23 = vpop.f32.mrb[2].mxu1 }
 0x236   : > { %415 = vst [vmem:[%s2044_s23 + $0x28] sm:$0xff] %v406_v23  ;;  %v1257_v24 = vpop.f32.mrb[3].mxu1 }
 0x237   : > { %v360_v25 = vpop.f32.mrb[0].mxu0 }
 0x238   : > { %410 = vst [vmem:[%s2044_s23] sm:$0xff] %v360_v25  ;;  %v362_v26 = vpop.f32.mrb[1].mxu0 }
 0x239   : > { %411 = vst [vmem:[%s2044_s23 + $0x8] sm:$0xff] %v362_v26  ;;  %v364_v28 = vpop.f32.mrb[2].mxu0 }
 0x23a   : > { %413 = vst [vmem:[%s2044_s23 + $0x18] sm:$0xff] %v364_v28  ;;  %v366_v0 = vpop.f32.mrb[3].mxu0 }
 0x23b   : > { %414 = vst [vmem:[%s2044_s23 + $0x20] sm:$0xff] %v366_v0 }
 0x253   : > { %v614_v3 = vpop.f32.mrb[4].mxu1 }
 0x254   : > { %1192 = vst [vmem:[%s2044_s23 + $0x40] sm:$0xff] %v614_v3  ;;  %v1268_v2 = vpop.f32.mrb[5].mxu1 }
 0x255   : > { %v617_v29 = vpop.f32.mrb[6].mxu1 }
 0x256   : > { %v571_v1 = vpop.f32.mrb[4].mxu0  ;;  %1195 = vst [vmem:[%s2044_s23 + $0x58] sm:$0xff] %v617_v29  ;;  %v1269_v30 = vpop.f32.mrb[7].mxu1 }
 0x257   : > { %1190 = vst [vmem:[%s2044_s23 + $0x30] sm:$0xff] %v571_v1  ;;  %v573_v31 = vpop.f32.mrb[5].mxu0 }
 0x258   : > { %1191 = vst [vmem:[%s2044_s23 + $0x38] sm:$0xff] %v573_v31  ;;  %v575_v32 = vpop.f32.mrb[6].mxu0 }
 0x259   : > { %1193 = vst [vmem:[%s2044_s23 + $0x48] sm:$0xff] %v575_v32  ;;  %v577_v33 = vpop.f32.mrb[7].mxu0 }
 0x25a   : > { %1194 = vst [vmem:[%s2044_s23 + $0x50] sm:$0xff] %v577_v33 }
 0x273   : > { %v826_v34 = vpop.f32.mrb[8].mxu1 }
 0x274   : > { %1205 = vst [vmem:[%s2044_s23 + $0x70] sm:$0xff] %v826_v34  ;;  %v1280_v35 = vpop.f32.mrb[9].mxu1 }
 0x275   : > { %v829_v36 = vpop.f32.mrb[10].mxu1 }
 0x276   : > { %v783_v37 = vpop.f32.mrb[8].mxu0  ;;  %1208 = vst [vmem:[%s2044_s23 + $0x88] sm:$0xff] %v829_v36  ;;  %v1281_v38 = vpop.f32.mrb[11].mxu1 }
 0x277   : > { %1203 = vst [vmem:[%s2044_s23 + $0x60] sm:$0xff] %v783_v37  ;;  %v785_v39 = vpop.f32.mrb[9].mxu0 }
 0x278   : > { %1204 = vst [vmem:[%s2044_s23 + $0x68] sm:$0xff] %v785_v39  ;;  %v787_v40 = vpop.f32.mrb[10].mxu0 }
 0x279   : > { %1206 = vst [vmem:[%s2044_s23 + $0x78] sm:$0xff] %v787_v40  ;;  %v789_v41 = vpop.f32.mrb[11].mxu0 }
 0x27a   : > { %1207 = vst [vmem:[%s2044_s23 + $0x80] sm:$0xff] %v789_v41 }
 0x293   : > { %v1038_v42 = vpop.f32.mrb[12].mxu1 }
 0x294   : > { %1218 = vst [vmem:[%s2044_s23 + $0xa0] sm:$0xff] %v1038_v42  ;;  %v1292_v43 = vpop.f32.mrb[13].mxu1 }
 0x295   : > { %v1041_v44 = vpop.f32.mrb[14].mxu1 }
 0x296   : > { %v995_v45 = vpop.f32.mrb[12].mxu0  ;;  %1221 = vst [vmem:[%s2044_s23 + $0xb8] sm:$0xff] %v1041_v44  ;;  %v1293_v46 = vpop.f32.mrb[15].mxu1 }
 0x297   : > { %1216 = vst [vmem:[%s2044_s23 + $0x90] sm:$0xff] %v995_v45  ;;  %v997_v47 = vpop.f32.mrb[13].mxu0 }
 0x298   : > { %1217 = vst [vmem:[%s2044_s23 + $0x98] sm:$0xff] %v997_v47  ;;  %v999_v48 = vpop.f32.mrb[14].mxu0 }
 0x299   : > { %1219 = vst [vmem:[%s2044_s23 + $0xa8] sm:$0xff] %v999_v48  ;;  %v1001_v49 = vpop.f32.mrb[15].mxu0 }
 0x29a   : > { %1220 = vst [vmem:[%s2044_s23 + $0xb0] sm:$0xff] %v1001_v49 }
 0x29b   : > { %1466 = shalt.err (!%p1463_p5)
}
 0x29c   : > { %s1467_s17 = scalar_lea.hbm %s2072_s8, 3072  ;;  %s1471_s5 = scalar_lea.hbm %s2128_s2, 6144 }
 0x29d   : > { %p1468_p9 = scmp.ne.s32.totalorder %s2072_s8, %s1467_s17  ;;  %p1472_p3 = scmp.lt.u32.totalorder %s2072_s8, %s2128_s2 }
 0x29e   : > { %p1473_p7 = scmp.lt.u32.totalorder %s1471_s5, %s1467_s17  ;;  %p1475_p13 = scmp.lt.u32.totalorder %s1467_s17, %s2072_s8 }
 0x29f   : > { %p1469_p1 = pnand %p1468_p9, %p1671_p10 }
 0x2a0   : > { %p1474_p4 = por %p1473_p7, %p1472_p3 }
 0x2a1   : > { %p1470_p2 = pneg %p1469_p1 }
 0x2a2   : > { %p1476_p6 = por %p1475_p13, %p1474_p4 }
 0x2a4   : > { %p1477_p8 = pnand %p1476_p6, %p1470_p2 }
 0x2a6   : > { %1480 = shalt.err (!%p1477_p8)
}
 0x2a7   : > { %s1558_s27 = smov 384   ;;  %s1559_s23 = smov 24  }
 0x2a8   : > { %1302 = dma.vmem_to_hbm [thread:$0]  (%p1671_p10), %s2074_s30, 3072, %s2072_s8, %s1053_s12, %s1558_s27, %s1558_s27, %s1559_s23  }
 0x2a9 PF: > { %s1084_s29 = sand.u32 1, %s1519_s9   ;;  %p2146_p12 = scmp.ne.s32.totalorder %s2136_s20, 0 }
 0x2aa   : > { %p2147_p11 = scmp.ge.s32.totalorder %s1539_s14, 2  ;;  %s1085_s3 = scalar_lea.sflag [#allocation4], %s1084_s29 }
 0x2ac   : > { %p1313_p0 = pnand %p2147_p11, %p2146_p12 }
 0x2ae   : > { %1514 = dma.done.wait (!%p1313_p0), %s1085_s3, 3072  }
 0x2af   : > { %1516 = vsyncadd (!%p1313_p0), %s1085_s3, 4294964224  ;;  %s19_s14 = sadd.s32 1, %s1539_s14   ;;  %s2148_s9 = smov %s1523_s10 }
 0x2b0   : > { %p16_p5 = scmp.ge.s32.totalorder %s19_s14, 4   ;;  %s2149_s10 = smov %s1527_s11 }
 0x2b1   : > { %s2150_s11 = smov %s1680_s28  ;;  %s2151_s12 = smov %s1535_s13 }
 0x2b2   : > { %s2152_s13 = smov %s2154_s25  ;;  %18 = sbr.rel (!%p16_p5) target bundleno = 7 (0x7), region = 84 }
 0x2b9   :  { %1090 = vsyncpa [#allocation3], 1 }
 0x2ba   :  { %1092 = vsyncpa [#allocation3 + $0x1], 1 }
 0x2bb   :  { %1093 = vsyncpa [#allocation6], 1 }
 0x2bc   :  { %1094 = vsyncpa [#allocation4], 1 }
 0x2bd   :  { %1096 = vsyncpa [#allocation4 + $0x1], 1 }

</bundles_post_ra>
